<compile_context>
chip_gen: v7x
topology: tpu7x:2x2x1
jax: 0.10.0
libtpu: 0.0.40
codegen_flags: <defaults>
</compile_context>

<pallas_src>
import jax
import jax.numpy as jnp
from jax.experimental import pallas as pl
from jax.experimental.pallas import tpu as pltpu

EPS = 1e-5
_MXU_DTYPE = jnp.bfloat16      # MXU operand / HBM intermediate dtype; accumulation stays f32


# --------------------------------------------------------------------------- #
# BlockSpec / sizing helpers
# --------------------------------------------------------------------------- #
def _bcast_spec(shape):
    nd = len(shape)
    return pl.BlockSpec(tuple(shape), lambda *_: (0,) * nd)


def _sample_spec(shape):
    nd = len(shape)
    return pl.BlockSpec((1,) + tuple(shape[1:]), lambda n, *_: (n,) + (0,) * (nd - 1))


def _vmem_limit_bytes():
    try:
        cap = int(pltpu.get_tpu_info().vmem_capacity_bytes)
    except Exception:            # conservative fallback, safe on v5e/v6e/v7x
        cap = 64 << 20
    return min(cap * 3 // 4, 100 << 20)


def _pick_band(Ho, stride, W, D):
    """Largest band (divisor of Ho; multiple of 8 or == Ho) whose per-band set fits ~6 MiB."""
    cands = sorted({d for d in range(8, Ho, 8) if Ho % d == 0} | {Ho})
    budget = 6 << 20
    best = cands[0]
    for c in cands:
        hb = c * stride + 2
        est = hb * W * D * 4 * 2 + hb * (W + 4) * D * 2 + c * (W // stride) * D * 4
        if est <= budget:
            best = c
    return best


def _finalize_bn(partials, count, gamma, beta):
    tot = jnp.sum(partials, axis=0)                   # (2, C)
    mean = tot[0] / count
    var = tot[1] / count - mean * mean                # biased (training-mode) variance
    scale = gamma * jax.lax.rsqrt(var + EPS)
    shift = beta - mean * scale
    return (scale.reshape(1, -1).astype(jnp.float32),
            shift.reshape(1, -1).astype(jnp.float32))


# --------------------------------------------------------------------------- #
# Pass 1: BN1 batch statistics (+ strided identity shortcut when stride > 1)
# --------------------------------------------------------------------------- #
def _make_stats_kernel(H, W, C, stride, need_xs):
    Ho, Wo = H // stride, W // stride

    def kernel(*refs):
        if need_xs:
            x_ref, st_ref, xs_ref = refs
        else:
            x_ref, st_ref = refs
        xv = x_ref[0]                                             # (H, W, C) f32
        flat = xv.reshape(H * W, C)
        st_ref[0] = jnp.concatenate(
            [jnp.sum(flat, axis=0, keepdims=True),
             jnp.sum(flat * flat, axis=0, keepdims=True)], axis=0)
        if need_xs:
            # MaxPool2d(1, stride) == strided spatial subsample of x (shortcut source)
            xr = xv.reshape(Ho, stride, W, C)[:, 0]               # (Ho, W, C)
            xs_ref[0] = xr.reshape(Ho, Wo, stride * C)[:, :, :C]  # (Ho, Wo, C)

    return kernel


# --------------------------------------------------------------------------- #
# Pass 2: BN1 -> conv3x3(s=1,p=1) -> PReLU -> conv3x3(stride,p=1) (+ 1x1 shortcut)
#         H row-band tiled with a 1-row halo; grid = (N, n_bands)
# --------------------------------------------------------------------------- #
def _make_res_kernel(H, W, C, D, stride, BAND, nb, proj, pack):
    Wo = W // stride
    HB = BAND * stride + 2                       # conv1 rows per band (incl. conv2 halo)
    Wp = -(-(W + 2) // stride) * stride          # padded conv1-output width, mult. of stride
    Wos = Wp // stride

    def kernel(*refs):
        if proj:
            (x_ref, a1_ref, b1_ref, w1_ref, alpha_ref, w2_ref, wsc_ref,
             r_ref, st2_ref, sc_ref, stsc_ref, xpad, hpad) = refs
        else:
            (x_ref, a1_ref, b1_ref, w1_ref, alpha_ref, w2_ref,
             r_ref, st2_ref, xpad, hpad) = refs

        b = pl.program_id(1)
        hs0 = pl.multiple_of(b * (BAND * stride), BAND * stride)

        # ---- once per sample: BN1 (f32 affine) into the zero-halo padded scratch ----
        @pl.when(b == 0)
        def _():
            xn = (x_ref[0].astype(jnp.float32) * a1_ref[...].reshape(1, 1, C)
                  + b1_ref[...].reshape(1, 1, C)).astype(_MXU_DTYPE)
            xpad[0:2, :, :] = jnp.zeros((2, W + 2, C), _MXU_DTYPE)
            xpad[H + 2:H + 4, :, :] = jnp.zeros((2, W + 2, C), _MXU_DTYPE)
            xpad[:, 0:1, :] = jnp.zeros((H + 4, 1, C), _MXU_DTYPE)
            xpad[:, W + 1:W + 2, :] = jnp.zeros((H + 4, 1, C), _MXU_DTYPE)
            xpad[2:H + 2, 1:W + 1, :] = xn

        # conv2's zero column pads (never written below; refresh cheaply every band)
        hpad[:, 0:1, :] = jnp.zeros((HB, 1, D), _MXU_DTYPE)
        hpad[:, W + 1:Wp, :] = jnp.zeros((HB, Wp - W - 1, D), _MXU_DTYPE)

        # ---- conv1: 3x3 / s1 / p1 on the band (+halo rows) as 9 accumulated matmuls ----
        acc1 = jnp.zeros((HB * W, D), jnp.float32)
        for dy in range(3):
            for dx in range(3):
                slab = xpad[pl.ds(hs0 + dy, HB), dx:dx + W, :]            # (HB, W, C)
                acc1 = acc1 + jnp.dot(slab.reshape(HB * W, C),
                                      w1_ref[dy * 3 + dx],
                                      preferred_element_type=jnp.float32)

        # PReLU (per-channel alpha, f32 VPU math), then stage the band for conv2
        h = jnp.where(acc1 > 0, acc1, alpha_ref[...] * acc1)
        hpad[:, 1:W + 1, :] = h.astype(_MXU_DTYPE).reshape(HB, W, D)

        # conv2's zero row halo only exists at the image top / bottom
        @pl.when(b == 0)
        def _():
            hpad[0:1, :, :] = jnp.zeros((1, Wp, D), _MXU_DTYPE)

        @pl.when(b == nb - 1)
        def _():
            hpad[HB - 1:HB, :, :] = jnp.zeros((1, Wp, D), _MXU_DTYPE)

        # ---- conv2: 3x3 / stride s / p1, evaluated only at the strided output grid.
        #      Rows: strided read from the staging scratch; cols: stride folded into
        #      lanes (space-to-depth) + static phase slices.  9 accumulated matmuls. ----
        acc2 = jnp.zeros((BAND * Wo, D), jnp.float32)
        for dy in range(3):
            if stride == 1:
                rows = hpad[pl.ds(dy, BAND), :, :]
            else:
                rows = hpad[pl.ds(dy, BAND, stride), :, :]                # (BAND, Wp, D)
            rows = rows.reshape(BAND, Wos, stride * D)
            for dx in range(3):
                u0, ph = dx // stride, dx % stride
                tap = rows[:, u0:u0 + Wo, ph * D:(ph + 1) * D]            # (BAND, Wo, D)
                acc2 = acc2 + jnp.dot(tap.reshape(BAND * Wo, D),
                                      w2_ref[dy * 3 + dx],
                                      preferred_element_type=jnp.float32)

        # bf16 HBM intermediate, lane-dense (BAND, Wo*D) when D < 128
        if pack:
            r_ref[0] = acc2.astype(_MXU_DTYPE).reshape(BAND, Wo * D)
        else:
            r_ref[0] = acc2.astype(_MXU_DTYPE).reshape(BAND, Wo, D)

        # per-band BN2 partial stats accumulated into the resident (1, 2, D) output block
        part2 = jnp.concatenate([jnp.sum(acc2, axis=0, keepdims=True),
                                 jnp.sum(acc2 * acc2, axis=0, keepdims=True)], axis=0)

        @pl.when(b == 0)
        def _():
            st2_ref[0] = part2

        @pl.when(b > 0)
        def _():
            st2_ref[0] += part2

        if proj:
            # 1x1 / stride-s shortcut conv on the raw input rows of this band, computed
            # exactly once (pass 3 only applies the BN affine).
            if stride == 1:
                xr = x_ref[:, pl.ds(hs0, BAND), :, :]
            else:
                xr = x_ref[:, pl.ds(hs0, BAND, stride), :, :]             # (1, BAND, W, C)
            xr = xr.reshape(BAND, Wo, stride * C)[:, :, :C]               # strided cols
            scv = jnp.dot(xr.astype(_MXU_DTYPE).reshape(BAND * Wo, C), wsc_ref[...],
                          preferred_element_type=jnp.float32)
            if pack:
                sc_ref[0] = scv.astype(_MXU_DTYPE).reshape(BAND, Wo * D)
            else:
                sc_ref[0] = scv.astype(_MXU_DTYPE).reshape(BAND, Wo, D)
            partsc = jnp.concatenate([jnp.sum(scv, axis=0, keepdims=True),
                                      jnp.sum(scv * scv, axis=0, keepdims=True)], axis=0)

            @pl.when(b == 0)
            def _():
                stsc_ref[0] = partsc

            @pl.when(b > 0)
            def _():
                stsc_ref[0] += partsc

    return kernel


# --------------------------------------------------------------------------- #
# Pass 3: BN2 -> SE -> shortcut -> residual add (per-sample; SE pools globally)
# --------------------------------------------------------------------------- #
def _make_tail_kernel(Ho, Wo, C, D, proj, pack):
    def kernel(*refs):
        if proj:
            (r_ref, sc_ref, a2_ref, b2_ref, sw1_ref, sw2_ref,
             asc_ref, bsc_ref, out_ref) = refs
        else:
            (r_ref, s_ref, a2_ref, b2_ref, sw1_ref, sw2_ref, out_ref) = refs

        rn = r_ref[0].astype(jnp.float32).reshape(Ho * Wo, D)
        rn = rn * a2_ref[...] + b2_ref[...]                         # BN2 (batch affine)

        # SE: global avg-pool -> fc1 -> ReLU -> fc2 -> sigmoid -> scale
        pooled = jnp.mean(rn, axis=0, keepdims=True)                # (1, D)
        s1 = jnp.maximum(jnp.dot(pooled, sw1_ref[...],
                                 preferred_element_type=jnp.float32), 0.0)
        s2 = jnp.dot(s1, sw2_ref[...], preferred_element_type=jnp.float32)
        gate = 1.0 / (1.0 + jnp.exp(-s2))                           # (1, D)
        res = rn * gate

        if proj:
            sc = sc_ref[0].astype(jnp.float32).reshape(Ho * Wo, D)
            sc = sc * asc_ref[...] + bsc_ref[...]                   # shortcut BN affine
        else:
            sc = s_ref[0].reshape(Ho * Wo, C)                       # MaxPool2d(1, s) identity

        out = res + sc
        if pack:
            out_ref[0] = out.reshape(Ho, Wo * D)
        else:
            out_ref[0] = out.reshape(Ho, Wo, D)

    return kernel


# --------------------------------------------------------------------------- #
# Wrapper
# --------------------------------------------------------------------------- #
def bottleneck_ir_se(x_nchw, params, in_channel, depth, stride, band=None):
    N, C, H, W = x_nchw.shape
    assert C == in_channel
    # TODO(synk): PyTorch conv(pad=1, stride=2) also handles odd H/W via floor division.
    assert H % stride == 0 and W % stride == 0
    Ho, Wo = H // stride, W // stride
    proj = in_channel != depth
    pack = depth < 128                      # lane-dense (Ho, Wo*D) packing for narrow depths

    x = jnp.transpose(x_nchw, (0, 2, 3, 1)).astype(jnp.float32)     # NHWC
    vmem = _vmem_limit_bytes()
    par1 = pltpu.CompilerParams(dimension_semantics=("parallel",))

    # ---------------- pass 1: BN1 stats (+ strided identity shortcut) ----------------
    need_xs = (not proj) and stride > 1
    st1_shape = jax.ShapeDtypeStruct((N, 2, C), jnp.float32)
    p1_kernel = _make_stats_kernel(H, W, C, stride, need_xs)
    if need_xs:
        part1, xs = pl.pallas_call(
            p1_kernel,
            out_shape=(st1_shape, jax.ShapeDtypeStruct((N, Ho, Wo, C), jnp.float32)),
            grid=(N,),
            in_specs=[_sample_spec(x.shape)],
            out_specs=(_sample_spec((N, 2, C)), _sample_spec((N, Ho, Wo, C))),
            compiler_params=par1,
        )(x)
    else:
        part1 = pl.pallas_call(
            p1_kernel,
            out_shape=st1_shape,
            grid=(N,),
            in_specs=[_sample_spec(x.shape)],
            out_specs=_sample_spec((N, 2, C)),
            compiler_params=par1,
        )(x)
        xs = x if stride == 1 else None      # identity + stride 1: shortcut is x itself
    a1, b1 = _finalize_bn(part1, N * H * W, params['g1'], params['b1'])

    # ---------------- pass 2: band-tiled residual-branch convolutions ----------------
    BAND = band if band is not None else _pick_band(Ho, stride, W, depth)
    if Ho % BAND != 0 or (BAND != Ho and BAND % 8 != 0):
        raise ValueError(f"band {BAND} must divide Ho={Ho} and be a multiple of 8")
    nb = Ho // BAND
    HB = BAND * stride + 2
    Wp = -(-(W + 2) // stride) * stride

    # per-tap weight slabs: OIHW -> (ky, kx, in, out) -> (9, in, out), bf16 MXU operands
    w1 = jnp.transpose(params['w1'], (2, 3, 1, 0)).reshape(9, C, depth).astype(_MXU_DTYPE)
    w2 = jnp.transpose(params['w2'], (2, 3, 1, 0)).reshape(9, depth, depth).astype(_MXU_DTYPE)
    alpha = params['alpha'].reshape(1, depth).astype(jnp.float32)

    if pack:
        r_shape = jax.ShapeDtypeStruct((N, Ho, Wo * depth), _MXU_DTYPE)
        r_spec = pl.BlockSpec((1, BAND, Wo * depth), lambda n, b: (n, b, 0))
    else:
        r_shape = jax.ShapeDtypeStruct((N, Ho, Wo, depth), _MXU_DTYPE)
        r_spec = pl.BlockSpec((1, BAND, Wo, depth), lambda n, b: (n, b, 0, 0))
    st_shape = jax.ShapeDtypeStruct((N, 2, depth), jnp.float32)
    st_spec = pl.BlockSpec((1, 2, depth), lambda n, b: (n, 0, 0))

    scratch = [pltpu.VMEM((H + 4, W + 2, C), _MXU_DTYPE),     # BN1'd zero-halo input plane
               pltpu.VMEM((HB, Wp, depth), _MXU_DTYPE)]        # conv1 band staging buffer
    par2 = pltpu.CompilerParams(dimension_semantics=("parallel", "arbitrary"),
                                vmem_limit_bytes=vmem)
    res_kernel = _make_res_kernel(H, W, C, depth, stride, BAND, nb, proj, pack)

    common_in = [_sample_spec(x.shape), _bcast_spec(a1.shape), _bcast_spec(b1.shape),
                 _bcast_spec(w1.shape), _bcast_spec(alpha.shape), _bcast_spec(w2.shape)]

    if proj:
        wsc = params['wsc'][:, :, 0, 0].T.astype(_MXU_DTYPE)           # (Cin, D)
        r, part2, sc, partsc = pl.pallas_call(
            res_kernel,
            out_shape=(r_shape, st_shape, r_shape, st_shape),
            grid=(N, nb),
            in_specs=common_in + [_bcast_spec(wsc.shape)],
            out_specs=(r_spec, st_spec, r_spec, st_spec),
            scratch_shapes=scratch,
            compiler_params=par2,
        )(x, a1, b1, w1, alpha, w2, wsc)
        asc, bsc = _finalize_bn(partsc, N * Ho * Wo, params['gsc'], params['bsc'])
    else:
        r, part2 = pl.pallas_call(
            res_kernel,
            out_shape=(r_shape, st_shape),
            grid=(N, nb),
            in_specs=common_in,
            out_specs=(r_spec, st_spec),
            scratch_shapes=scratch,
            compiler_params=par2,
        )(x, a1, b1, w1, alpha, w2)
    a2, b2 = _finalize_bn(part2, N * Ho * Wo, params['g2'], params['b2'])

    # ---------------- pass 3: BN2 + SE + shortcut + add ----------------
    sw1 = params['se_w1'][:, :, 0, 0].T.astype(jnp.float32)            # (D, D//16)
    sw2 = params['se_w2'][:, :, 0, 0].T.astype(jnp.float32)            # (D//16, D)
    tail_kernel = _make_tail_kernel(Ho, Wo, C, depth, proj, pack)

    if pack:
        out_shape = jax.ShapeDtypeStruct((N, Ho, Wo * depth), jnp.float32)
        out_spec = _sample_spec((N, Ho, Wo * depth))
    else:
        out_shape = jax.ShapeDtypeStruct((N, Ho, Wo, depth), jnp.float32)
        out_spec = _sample_spec((N, Ho, Wo, depth))

    if proj:
        ins = (r, sc, a2, b2, sw1, sw2, asc, bsc)
    else:
        ins = (r, xs, a2, b2, sw1, sw2)
    in_specs3 = [_sample_spec(ins[0].shape), _sample_spec(ins[1].shape)] + \
                [_bcast_spec(a.shape) for a in ins[2:]]
    out = pl.pallas_call(
        tail_kernel,
        out_shape=out_shape,
        grid=(N,),
        in_specs=in_specs3,
        out_specs=out_spec,
        compiler_params=par1,
    )(*ins)

    if pack:
        out = out.reshape(N, Ho, Wo, depth)
    return jnp.transpose(out, (0, 3, 1, 2))                            # back to NCHW


# --------------------------------------------------------------------------- #
# Deterministic parameter init (shapes follow the PyTorch module __init__)
# --------------------------------------------------------------------------- #
def init_params(key, in_channel, depth):
    ks = jax.random.split(key, 11)
    dr = depth // 16
    p = {
        'g1': 1.0 + 0.1 * jax.random.normal(ks[0], (in_channel,), jnp.float32),
        'b1': 0.1 * jax.random.normal(ks[1], (in_channel,), jnp.float32),
        'w1': jax.random.normal(ks[2], (depth, in_channel, 3, 3), jnp.float32)
              / (3.0 * float(in_channel) ** 0.5),
        'alpha': 0.25 * jnp.ones((depth,), jnp.float32),
        'w2': jax.random.normal(ks[3], (depth, depth, 3, 3), jnp.float32)
              / (3.0 * float(depth) ** 0.5),
        'g2': 1.0 + 0.1 * jax.random.normal(ks[4], (depth,), jnp.float32),
        'b2': 0.1 * jax.random.normal(ks[5], (depth,), jnp.float32),
        'se_w1': jax.random.normal(ks[6], (dr, depth, 1, 1), jnp.float32)
                 / float(depth) ** 0.5,
        'se_w2': jax.random.normal(ks[7], (depth, dr, 1, 1), jnp.float32)
                 / float(max(dr, 1)) ** 0.5,
    }
    if in_channel != depth:
        p['wsc'] = jax.random.normal(ks[8], (depth, in_channel, 1, 1), jnp.float32) \
                   / float(in_channel) ** 0.5
        p['gsc'] = 1.0 + 0.1 * jax.random.normal(ks[9], (depth,), jnp.float32)
        p['bsc'] = 0.1 * jax.random.normal(ks[10], (depth,), jnp.float32)
    return p


# --------------------------------------------------------------------------- #
# Pure-JAX reference (training-mode BN), used only for a sanity check
# --------------------------------------------------------------------------- #
def reference(x, p, in_channel, depth, stride):
    def bn(v, gamma, beta):
        mean = jnp.mean(v, axis=(0, 2, 3), keepdims=True)
        var = jnp.mean((v - mean) ** 2, axis=(0, 2, 3), keepdims=True)
        return (v - mean) * jax.lax.rsqrt(var + EPS) * gamma.reshape(1, -1, 1, 1) \
               + beta.reshape(1, -1, 1, 1)

    def conv(v, w, s, pad):
        return jax.lax.conv_general_dilated(
            v, w, (s, s), [(pad, pad), (pad, pad)],
            dimension_numbers=('NCHW', 'OIHW', 'NCHW'),
            precision=jax.lax.Precision.HIGHEST)

    h = bn(x, p['g1'], p['b1'])
    h = conv(h, p['w1'], 1, 1)
    a = p['alpha'].reshape(1, -1, 1, 1)
    h = jnp.where(h > 0, h, a * h)                     # PReLU
    h = conv(h, p['w2'], stride, 1)
    h = bn(h, p['g2'], p['b2'])
    pooled = jnp.mean(h, axis=(2, 3), keepdims=True)   # SE avg pool
    s1 = jnp.maximum(conv(pooled, p['se_w1'], 1, 0), 0.0)
    s2 = jax.nn.sigmoid(conv(s1, p['se_w2'], 1, 0))
    res = h * s2
    if in_channel == depth:
        shortcut = x[:, :, ::stride, ::stride]         # MaxPool2d(1, stride)
    else:
        shortcut = bn(conv(x, p['wsc'], stride, 0), p['gsc'], p['bsc'])
    return res + shortcut


if __name__ == "__main__":
    key = jax.random.PRNGKey(0)
    kx1, kx2, kp1, kp2, kp3, kp4, kp5 = jax.random.split(key, 7)

    N, Cin = 2, 16
    x16 = jax.random.normal(kx1, (N, Cin, 16, 16), jnp.float32)
    x32 = jax.random.normal(kx2, (N, Cin, 32, 32), jnp.float32)

    configs = [
        # (input, depth, stride, key, band)
        (x16, 32, 2, kp1, None),   # projection shortcut (1x1 conv + BN), stride 2
        (x16, 16, 2, kp2, None),   # identity shortcut (MaxPool(1,2)), stride 2
        (x16, 16, 1, kp3, 8),      # identity shortcut, stride 1, 2-band tiling
        (x32, 16, 2, kp4, 8),      # identity, stride 2, 2-band tiling (halo + strided rows)
        (x32, 32, 2, kp5, 8),      # projection, stride 2, 2-band tiling
    ]
    for xin, depth, stride, kp, band in configs:
        params = init_params(kp, Cin, depth)
        out = jax.block_until_ready(
            bottleneck_ir_se(xin, params, Cin, depth, stride, band=band))
        ref = reference(xin, params, Cin, depth, stride)
        H, W = xin.shape[2], xin.shape[3]
        assert out.shape == ref.shape == (N, depth, H // stride, W // stride)
        err = float(jnp.max(jnp.abs(out - ref)))
        # bf16 MXU operands + bf16 HBM intermediates vs f32 HIGHEST-precision reference
        assert err < 6e-2, f"depth={depth} stride={stride} band={band} max_err={err}"

    print("KERNEL_OK")
</pallas_src>

<mosaic_0001>
module attributes {stable_mosaic.version = 11 : i64} {
  func.func @kernel(%arg0: i32, %arg1: memref<1x16x16x16xf32, #tpu.memory_space<vmem>>, %arg2: memref<1x2x16xf32, #tpu.memory_space<vmem>>) attributes {dimension_semantics = [#tpu.dimension_semantics<parallel>], iteration_bounds = array<i64: 2>, scalar_prefetch = 0 : i64, scratch_operands = 0 : i64, tpu.core_type = #tpu.core_type<tc>, window_params = [{transform_indices = @transform_0, window_bounds = array<i64: 1, 16, 16, 16>}, {transform_indices = @transform_1, window_bounds = array<i64: 1, 2, 16>}]} {
    %c0 = arith.constant 0 : index
    %c0_0 = arith.constant 0 : index
    %c0_1 = arith.constant 0 : index
    %c0_2 = arith.constant 0 : index
    %0 = vector.load %arg1[%c0, %c0_0, %c0_1, %c0_2] : memref<1x16x16x16xf32, #tpu.memory_space<vmem>>, vector<1x16x16x16xf32>
    %1 = vector.shape_cast %0 : vector<1x16x16x16xf32> to vector<16x16x16xf32>
    %2 = vector.shape_cast %1 : vector<16x16x16xf32> to vector<256x16xf32>
    %cst = arith.constant dense<0.000000e+00> : vector<16xf32>
    %3 = vector.multi_reduction <add>, %2, %cst [0] : vector<256x16xf32> to vector<16xf32>
    %4 = vector.shape_cast %3 : vector<16xf32> to vector<1x16xf32>
    %5 = arith.mulf %2, %2 : vector<256x16xf32>
    %cst_3 = arith.constant dense<0.000000e+00> : vector<16xf32>
    %6 = vector.multi_reduction <add>, %5, %cst_3 [0] : vector<256x16xf32> to vector<16xf32>
    %7 = vector.shape_cast %6 : vector<16xf32> to vector<1x16xf32>
    %8 = tpu.concatenate %4, %7 in 0 : vector<1x16xf32>, vector<1x16xf32> -> vector<2x16xf32>
    %c0_4 = arith.constant 0 : index
    %c0_5 = arith.constant 0 : index
    %c0_6 = arith.constant 0 : index
    %9 = vector.load %arg2[%c0_4, %c0_5, %c0_6] : memref<1x2x16xf32, #tpu.memory_space<vmem>>, vector<1x2x16xf32>
    %10 = vector.shape_cast %9 : vector<1x2x16xf32> to vector<2x16xf32>
    %11 = vector.shape_cast %8 : vector<2x16xf32> to vector<1x2x16xf32>
    tpu.vector_store %arg2[%c0_4, %c0_5, %c0_6], %11 {strides = array<i32>} : memref<1x2x16xf32, #tpu.memory_space<vmem>>, vector<1x2x16xf32>,
    return
  }
  func.func @transform_0(%arg0: i32) -> (i32, i32, i32, i32) {
    %c0_i32 = arith.constant 0 : i32
    %c0_i32_0 = arith.constant 0 : i32
    %c0_i32_1 = arith.constant 0 : i32
    %c0_i32_2 = arith.constant 0 : i32
    return %arg0, %c0_i32, %c0_i32_0, %c0_i32_1 : i32, i32, i32, i32
  }
  func.func @transform_1(%arg0: i32) -> (i32, i32, i32) {
    %c0_i32 = arith.constant 0 : i32
    %c0_i32_0 = arith.constant 0 : i32
    %c0_i32_1 = arith.constant 0 : i32
    return %arg0, %c0_i32, %c0_i32_0 : i32, i32, i32
  }
}

</mosaic_0001>

<bundles_post_ra>
// kernel: tpu_custom_call.1
= control target key start
LH: loop header
LB: loop body
LE: loop exit
PB: predicated region body
PF: predicated region fallthrough
CT: control target
= control target key end

     0   :  { %6 = vsyncpa [#allocation3], 0  ;;  %s859_s0 = inlined_call_operand.hbm [shape: f32[2,16,16,16], index: 0, kind: input, shape index: {}]   ;;  %s860_s1 = inlined_call_operand.hbm [shape: f32[2,2,16], index: 1, kind: output, shape index: {}]  }
   0x1   :  { %8 = vsyncpa [#allocation3 + $0x1], 0 }
   0x2   :  { %9 = vsyncpa [#allocation4], 0 }
   0x3   :  { %11 = vsyncpa [#allocation4 + $0x1], 0  ;;  %s600_s6 = smov 0   ;;  %s602_s7 = smov 0  }
   0x4   :  { %s604_s8 = smov 0   ;;  %s606_s9 = smov 0  }
   0x5 LB: > { %s621_s10 = sadd.s32 4294967295, %s584_s9   ;;  %s426_s11 = sadd.s32 4294967294, %s584_s9   ;;  %s584_s9 = sphi %s606_s9, %s873_s9   ;;  %s580_s8 = sphi %s604_s8, %s872_s8   ;;  %s576_s7 = sphi %s602_s7, %s871_s7   ;;  %s572_s6 = sphi %s600_s6, %s870_s6  }
   0x6   : > { %s625_s12 = sadd.s32 1, %s584_s9   ;;  %s24_s13 = sadd.s32 1, %s580_s8 }
   0x7   : > { %s21_s14 = ssub.s32 %s584_s9, %s625_s12  ;;  %p31_p0 = scmp.ne.s32.totalorder %s580_s8, %s576_s7 }
   0x8   : > { %p22_p1 = scmp.eq.s32.totalorder %s21_s14, 0  ;;  %p32_p2 = scmp.eq.s32.totalorder %s584_s9, 0 }
   0x9   : > { %p37_p3 = scmp.ne.s32.totalorder %s576_s7, %s572_s6  ;;  %p38_p4 = scmp.eq.s32.totalorder %s621_s10, 0 }
   0xa   : > { %s637_s15 = scalar_select %p22_p1, %s580_s8, %s24_s13  }
   0xb   : > { %p639_p5 = por %p32_p2, %p31_p0  ;;  %p643_p6 = por %p38_p4, %p37_p3 }
   0xc   : > { %p61_p7 = scmp.eq.s32.totalorder %s621_s10, 1  ;;  %p67_p8 = scmp.eq.s32.totalorder %s426_s11, 1 }
   0xd   : > { %p452_p10 = scmp.lt.s32.totalorder %s584_s9, 2  ;;  %s87_s20 = sand.u32 1, %s580_s8  }
   0xe   : > { %p650_p11 = por %p61_p7, %p31_p0  ;;  %p654_p12 = por %p67_p8, %p37_p3 }
   0xf   : > { %s439_s21 = sshll.u32 %s584_s9, 12  ;;  %s429_s22 = sshll.u32 %s87_s20, 8 }
  0x10   : > { %s864_s18 = scalar_select %p650_p11, 1, 0 }
  0x11   : > { %s865_s19 = scalar_select %p654_p12, 1, 0 }
  0x12   : > { %s663_s25 = scalar_lea.hbm %s859_s0, %s439_s21  ;;  %s91_s26 = scalar_lea.vmem [#allocation2], %s429_s22 }
  0x13   : > { %s98_s27 = sshll.u32 %s91_s26, 4  ;;  %p667_p13 = pnand %p452_p10, %p639_p5  ;;  %s671_s27 = int_to_ptr.vmem [resolvable:$true] %s98_s27 }
  0x14   : > { %s673_s29 = scalar_lea.sflag [#allocation3], %s87_s20  ;;  %s488_s30 = scalar_lea.hbm %s663_s25, 4096 }
  0x15   : > { %p489_p0 = scmp.ne.s32.totalorder %s663_s25, %s488_s30  ;;  %p490_p1 = pneg %p667_p13 }
  0x16   : > { %s493_s4 = scalar_lea.hbm %s859_s0, 8192  ;;  %p494_p4 = scmp.lt.u32.totalorder %s663_s25, %s859_s0 }
  0x17   : > { %p491_p2 = pnand %p490_p1, %p489_p0  ;;  %p495_p5 = scmp.lt.u32.totalorder %s493_s4, %s488_s30 }
  0x18   : > { %p497_p8 = scmp.lt.u32.totalorder %s488_s30, %s663_s25 }
  0x19   : > { %p492_p3 = pneg %p491_p2  ;;  %p496_p7 = por %p495_p5, %p494_p4 }
  0x1b   : > { %p498_p10 = por %p497_p8, %p496_p7 }
  0x1d   : > { %p499_p9 = pnand %p498_p10, %p492_p3 }
  0x1f   : > { %502 = shalt.err (!%p499_p9)
}
  0x20   : > { %s503_s13 = scalar_lea.vmem %s671_s27, 4096  ;;  %s586_s14 = smov [#allocation2]  }
  0x21   : > { %p504_p0 = scmp.ne.s32.totalorder %s671_s27, %s503_s13  ;;  %s508_s16 = sshll.u32 %s586_s14, 4  ;;  %s509_s16 = int_to_ptr.vmem [resolvable:$false] %s508_s16 }
  0x22   : > { %s510_s20 = scalar_lea.vmem %s509_s16, 8192  ;;  %p511_p11 = scmp.lt.s32.totalorder %s671_s27, %s509_s16 }
  0x23   : > { %p506_p2 = pnand %p504_p0, %p490_p1  ;;  %p512_p4 = scmp.lt.s32.totalorder %s510_s20, %s503_s13 }
  0x25   : > { %p507_p12 = pneg %p506_p2  ;;  %p513_p5 = por %p512_p4, %p511_p11 }
  0x27   : > { %p514_p7 = pnand %p513_p5, %p507_p12 }
  0x29   : > { %517 = shalt.err (!%p514_p7)
}
  0x2a   : > { %s587_s21 = smov 128   ;;  %s588_s22 = smov 8  }
  0x2b   : > { %447 = dma.hbm_to_vmem [thread:$0]  (!%p667_p13), %s663_s25, 4096, %s671_s27, %s673_s29, %s587_s21, %s587_s21, %s588_s22  }
  0x2c   : > { %p432_p9 = scmp.ge.s32.totalorder %s584_s9, 1  ;;  %p106_p1 = scmp.lt.s32.totalorder %s584_s9, 3 }
  0x2e   : > { %p107_p3 = pnand %p432_p9, %p106_p1 }
  0x2f   : > { %s704_s23 = sand.u32 (!%p107_p3), 1, %s576_s7  }
  0x30   : > { %110 = sbr.rel (%p107_p3) target bundleno = 152 (0x98), region = 24  ;;  %s433_s24 = sshll.u32 (!%p107_p3), %s704_s23, 8 }
  0x31   : > { %s113_s26 = scalar_lea.sflag (!%p107_p3), [#allocation3], %s704_s23  ;;  %s708_s30 = scalar_lea.vmem (!%p107_p3), [#allocation2], %s433_s24 }
  0x37   : > { %563 = dma.done.wait (%p643_p6), %s113_s26, 4096  }
  0x38   : > { %565 = vsyncadd (%p643_p6), %s113_s26, 4294963200  ;;  %vm167_vm0 = vcmask 130048   ;;  %v135_v0 = vld [vmem:[%s708_s30] sm:$0xff]  ;;  %v136_v1 = vld [vmem:[%s708_s30 + $0x8] sm:$0xff]  ;;  %s434_s17 = sshll.u32 %s704_s23, 1  ;;  %s436_s25 = sshll.u32 %s621_s10, 5 }
  0x39   : > { %v137_v2 = vld [vmem:[%s708_s30 + $0x10] sm:$0xff]  ;;  %v168_v3 = vsel %vm167_vm0, %v135_v0, 0.0  ;;  %v169_v4 = vsel %vm167_vm0, %v136_v1, 0.0  ;;  %v138_v6 = vld [vmem:[%s708_s30 + $0x18] sm:$0xff]  ;;  %v139_v9 = vld [vmem:[%s708_s30 + $0x20] sm:$0xff]  ;;  %v237_v27 = vmul.f32 %v135_v0, %v135_v0  ;;  %v238_v28 = vmul.f32 %v136_v1, %v136_v1  ;;  %s134_s27 = scalar_lea.vmem [#allocation5], %s434_s17  ;;  %s815_s3 = scalar_lea.hbm %s860_s1, %s436_s25 }
  0x3a   : > { %v171_v5 = vsel %vm167_vm0, %v137_v2, 0.0  ;;  %v170_v7 = vadd.f32 %v169_v4, %v168_v3  ;;  %v173_v8 = vsel %vm167_vm0, %v138_v6, 0.0  ;;  %v175_v11 = vsel %vm167_vm0, %v139_v9, 0.0  ;;  %v140_v12 = vld [vmem:[%s708_s30 + $0x28] sm:$0xff]  ;;  %v141_v15 = vld [vmem:[%s708_s30 + $0x30] sm:$0xff]  ;;  %v142_v18 = vld [vmem:[%s708_s30 + $0x38] sm:$0xff] }
  0x3b   : > { %v177_v14 = vsel %vm167_vm0, %v140_v12, 0.0  ;;  %v179_v17 = vsel %vm167_vm0, %v141_v15, 0.0  ;;  %v181_v20 = vsel %vm167_vm0, %v142_v18, 0.0  ;;  %v143_v21 = vld [vmem:[%s708_s30 + $0x40] sm:$0xff]  ;;  %v144_v24 = vld [vmem:[%s708_s30 + $0x48] sm:$0xff]  ;;  %v239_v29 = vmul.f32 %v137_v2, %v137_v2  ;;  %v145_v30 = vld [vmem:[%s708_s30 + $0x50] sm:$0xff] }
  0x3c   : > { %v172_v10 = vadd.f32 %v171_v5, %v170_v7  ;;  %v183_v23 = vsel %vm167_vm0, %v143_v21, 0.0  ;;  %v185_v26 = vsel %vm167_vm0, %v144_v24, 0.0  ;;  %v146_v32 = vld [vmem:[%s708_s30 + $0x58] sm:$0xff]  ;;  %v187_v33 = vsel %vm167_vm0, %v145_v30, 0.0  ;;  %v147_v41 = vld [vmem:[%s708_s30 + $0x60] sm:$0xff]  ;;  %v148_v47 = vld [vmem:[%s708_s30 + $0x68] sm:$0xff] }
  0x3d   : > { %v240_v34 = vmul.f32 %v138_v6, %v138_v6  ;;  %v189_v36 = vsel %vm167_vm0, %v146_v32, 0.0  ;;  %v241_v37 = vmul.f32 %v139_v9, %v139_v9  ;;  %v269_v38 = vsel %vm167_vm0, %v237_v27, 0.0  ;;  %v149_v53 = vld [vmem:[%s708_s30 + $0x70] sm:$0xff]  ;;  %v150_v59 = vld [vmem:[%s708_s30 + $0x78] sm:$0xff]  ;;  %v151_v1 = vld [vmem:[%s708_s30 + $0x80] sm:$0xff]  ;;  %s356_s28 = sshll.u32 %s134_s27, 4  ;;  %s817_s28 = int_to_ptr.vmem [resolvable:$true] %s356_s28 }
  0x3e   : > { %v174_v13 = vadd.f32 %v173_v8, %v172_v10  ;;  %v270_v39 = vsel %vm167_vm0, %v238_v28, 0.0  ;;  %v272_v40 = vsel %vm167_vm0, %v239_v29, 0.0  ;;  %v191_v44 = vsel %vm167_vm0, %v147_v41, 0.0  ;;  %v152_v7 = vld [vmem:[%s708_s30 + $0x88] sm:$0xff]  ;;  %s343_s4 = scalar_lea.sflag [#allocation4], %s704_s23  ;;  %s518_s5 = scalar_lea.vmem %s817_s28, 32 }
  0x3f   : > { %v271_v43 = vadd.f32 %v270_v39, %v269_v38  ;;  %v242_v45 = vmul.f32 %v140_v12, %v140_v12  ;;  %v274_v46 = vsel %vm167_vm0, %v240_v34, 0.0  ;;  %v193_v50 = vsel %vm167_vm0, %v148_v47, 0.0  ;;  %p519_p6 = scmp.ne.s32.totalorder %s817_s28, %s518_s5  ;;  %p867_p11 = scmp.ne.s32.totalorder %s864_s18, 0 }
  0x40   : > { %v176_v16 = vadd.f32 %v175_v11, %v174_v13  ;;  %v243_v51 = vmul.f32 %v141_v15, %v141_v15  ;;  %v276_v52 = vsel %vm167_vm0, %v241_v37, 0.0  ;;  %v195_v56 = vsel %vm167_vm0, %v149_v53, 0.0  ;;  %v153_v13 = vld [vmem:[%s708_s30 + $0x90] sm:$0xff]  ;;  %s589_s10 = smov [#allocation5]  }
  0x41   : > { %v273_v49 = vadd.f32 %v272_v40, %v271_v43  ;;  %v244_v57 = vmul.f32 %v142_v18, %v142_v18  ;;  %v278_v58 = vsel %vm167_vm0, %v242_v45, 0.0  ;;  %v197_v62 = vsel %vm167_vm0, %v150_v59, 0.0  ;;  %v157_v37 = vld [vmem:[%s708_s30 + $0xb0] sm:$0xff]  ;;  %v158_v43 = vld [vmem:[%s708_s30 + $0xb8] sm:$0xff]  ;;  %p520_p12 = pnand %p519_p6, %p867_p11  ;;  %s522_s11 = sshll.u32 %s589_s10, 4  ;;  %s523_s11 = int_to_ptr.vmem [resolvable:$false] %s522_s11 }
  0x42   : > { %v178_v19 = vadd.f32 %v177_v14, %v176_v16  ;;  %v245_v63 = vmul.f32 %v143_v21, %v143_v21  ;;  %v280_v0 = vsel %vm167_vm0, %v243_v51, 0.0  ;;  %v199_v4 = vsel %vm167_vm0, %v151_v1, 0.0  ;;  %s524_s13 = scalar_lea.vmem %s523_s11, 64  ;;  %p525_p8 = scmp.lt.s32.totalorder %s817_s28, %s523_s11 }
  0x43   : > { %v275_v55 = vadd.f32 %v274_v46, %v273_v49  ;;  %v246_v5 = vmul.f32 %v144_v24, %v144_v24  ;;  %v282_v6 = vsel %vm167_vm0, %v244_v57, 0.0  ;;  %v201_v10 = vsel %vm167_vm0, %v152_v7, 0.0  ;;  %v159_v49 = vld [vmem:[%s708_s30 + $0xc0] sm:$0xff]  ;;  %p521_p13 = pneg %p520_p12  ;;  %p526_p10 = scmp.lt.s32.totalorder %s524_s13, %s518_s5 }
  0x44   : > { %v180_v22 = vadd.f32 %v179_v17, %v178_v19  ;;  %v247_v11 = vmul.f32 %v145_v30, %v145_v30  ;;  %v284_v12 = vsel %vm167_vm0, %v245_v63, 0.0  ;;  %v203_v16 = vsel %vm167_vm0, %v153_v13, 0.0  ;;  %v154_v19 = vld [vmem:[%s708_s30 + $0x98] sm:$0xff] }
  0x45   : > { %v277_v61 = vadd.f32 %v276_v52, %v275_v55  ;;  %v248_v17 = vmul.f32 %v146_v32, %v146_v32  ;;  %v286_v18 = vsel %vm167_vm0, %v246_v5, 0.0  ;;  %v250_v29 = vmul.f32 %v148_v47, %v148_v47  ;;  %v160_v55 = vld [vmem:[%s708_s30 + $0xc8] sm:$0xff]  ;;  %p527_p0 = por %p526_p10, %p525_p8 }
  0x46   : > { %v182_v25 = vadd.f32 %v181_v20, %v180_v22  ;;  %v205_v22 = vsel %vm167_vm0, %v154_v19, 0.0  ;;  %v288_v24 = vsel %vm167_vm0, %v247_v11, 0.0  ;;  %v211_v40 = vsel %vm167_vm0, %v157_v37, 0.0 }
  0x47   : > { %v279_v3 = vadd.f32 %v278_v58, %v277_v61  ;;  %v290_v30 = vsel %vm167_vm0, %v248_v17, 0.0  ;;  %v213_v46 = vsel %vm167_vm0, %v158_v43, 0.0  ;;  %v253_v47 = vmul.f32 %v151_v1, %v151_v1  ;;  %v161_v61 = vld [vmem:[%s708_s30 + $0xd0] sm:$0xff]  ;;  %p528_p2 = pnand %p527_p0, %p521_p13 }
  0x48   : > { %v184_v31 = vadd.f32 %v183_v23, %v182_v25  ;;  %v249_v23 = vmul.f32 %v147_v41, %v147_v41  ;;  %v155_v25 = vld [vmem:[%s708_s30 + $0xa0] sm:$0xff]  ;;  %v252_v41 = vmul.f32 %v150_v59, %v150_v59  ;;  %v215_v52 = vsel %vm167_vm0, %v159_v49, 0.0 }
  0x49   : > { %v281_v9 = vadd.f32 %v280_v0, %v279_v3  ;;  %v207_v28 = vsel %vm167_vm0, %v155_v25, 0.0  ;;  %v217_v58 = vsel %vm167_vm0, %v160_v55, 0.0  ;;  %v255_v59 = vmul.f32 %v153_v13, %v153_v13  ;;  %v162_v3 = vld [vmem:[%s708_s30 + $0xd8] sm:$0xff] }
  0x4a   : > { %v186_v35 = vadd.f32 %v185_v26, %v184_v31  ;;  %v156_v31 = vld [vmem:[%s708_s30 + $0xa8] sm:$0xff]  ;;  %v219_v0 = vsel %vm167_vm0, %v161_v61, 0.0  ;;  %v256_v1 = vmul.f32 %v154_v19, %v154_v19  ;;  %v259_v19 = vmul.f32 %v157_v37, %v157_v37 }
  0x4b   : > { %v283_v15 = vadd.f32 %v282_v6, %v281_v9  ;;  %v209_v34 = vsel %vm167_vm0, %v156_v31, 0.0  ;;  %v221_v6 = vsel %vm167_vm0, %v162_v3, 0.0  ;;  %v163_v9 = vld [vmem:[%s708_s30 + $0xe0] sm:$0xff]  ;;  %v258_v13 = vmul.f32 %v156_v31, %v156_v31 }
  0x4c   : > { %v188_v42 = vadd.f32 %v187_v33, %v186_v35  ;;  %v251_v35 = vmul.f32 %v149_v53, %v149_v53  ;;  %v254_v53 = vmul.f32 %v152_v7, %v152_v7  ;;  %v257_v7 = vmul.f32 %v155_v25, %v155_v25  ;;  %v165_v25 = vld [vmem:[%s708_s30 + $0xf0] sm:$0xff] }
  0x4d   : > { %v285_v21 = vadd.f32 %v284_v12, %v283_v15  ;;  %v223_v12 = vsel %vm167_vm0, %v163_v9, 0.0  ;;  %v164_v15 = vld [vmem:[%s708_s30 + $0xe8] sm:$0xff]  ;;  %vm338_vm1 = vcmask 1040384   ;;  %vm340_vm2 = vcmask 123904  }
  0x4e   : > { %v190_v48 = vadd.f32 %v189_v36, %v188_v42  ;;  %v292_v36 = vsel %vm167_vm0, %v249_v23, 0.0  ;;  %v294_v42 = vsel %vm167_vm0, %v250_v29, 0.0  ;;  %v260_v23 = vmul.f32 %v158_v43, %v158_v43 }
  0x4f   : > { %v287_v27 = vadd.f32 %v286_v18, %v285_v21  ;;  %v225_v18 = vsel %vm167_vm0, %v164_v15, 0.0  ;;  %v261_v29 = vmul.f32 %v159_v49, %v159_v49 }
  0x50   : > { %v192_v54 = vadd.f32 %v191_v44, %v190_v48  ;;  %v296_v48 = vsel %vm167_vm0, %v251_v35, 0.0 }
  0x51   : > { %v289_v33 = vadd.f32 %v288_v24, %v287_v27  ;;  %v310_v24 = vsel %vm167_vm0, %v258_v13, 0.0 }
  0x52   : > { %v194_v60 = vadd.f32 %v193_v50, %v192_v54  ;;  %v298_v54 = vsel %vm167_vm0, %v252_v41, 0.0  ;;  %v264_v41 = vmul.f32 %v162_v3, %v162_v3 }
  0x53   : > { %v291_v39 = vadd.f32 %v290_v30, %v289_v33  ;;  %v312_v30 = vsel %vm167_vm0, %v259_v19, 0.0  ;;  %v314_v33 = vsel %vm167_vm0, %v260_v23, 0.0 }
  0x54   : > { %v196_v2 = vadd.f32 %v195_v56, %v194_v60  ;;  %v300_v60 = vsel %vm167_vm0, %v253_v47, 0.0  ;;  %v322_v49 = vsel %vm167_vm0, %v264_v41, 0.0 }
  0x55   : > { %v293_v45 = vadd.f32 %v292_v36, %v291_v39  ;;  %v316_v39 = vsel %vm167_vm0, %v261_v29, 0.0 }
  0x56   : > { %v198_v8 = vadd.f32 %v197_v62, %v196_v2  ;;  %v302_v2 = vsel %vm167_vm0, %v254_v53, 0.0 }
  0x57   : > { %v295_v51 = vadd.f32 %v294_v42, %v293_v45  ;;  %v265_v45 = vmul.f32 %v163_v9, %v163_v9 }
  0x58   : > { %v200_v14 = vadd.f32 %v199_v4, %v198_v8  ;;  %v304_v8 = vsel %vm167_vm0, %v255_v59, 0.0 }
  0x59   : > { %v297_v57 = vadd.f32 %v296_v48, %v295_v51  ;;  %v266_v48 = vmul.f32 %v164_v15, %v164_v15  ;;  %v324_v53 = vsel %vm167_vm0, %v265_v45, 0.0 }
  0x5a   : > { %v202_v20 = vadd.f32 %v201_v10, %v200_v14  ;;  %v306_v14 = vsel %vm167_vm0, %v256_v1, 0.0 }
  0x5b   : > { %v299_v63 = vadd.f32 %v298_v54, %v297_v57 }
  0x5c   : > { %v204_v26 = vadd.f32 %v203_v16, %v202_v20  ;;  %v308_v20 = vsel %vm167_vm0, %v257_v7, 0.0 }
  0x5d   : > { %v301_v5 = vadd.f32 %v300_v60, %v299_v63 }
  0x5e   : > { %v206_v32 = vadd.f32 %v205_v22, %v204_v26 }
  0x5f   : > { %v303_v11 = vadd.f32 %v302_v2, %v301_v5 }
  0x60   : > { %v208_v38 = vadd.f32 %v207_v28, %v206_v32  ;;  %v227_v28 = vsel %vm167_vm0, %v165_v25, 0.0  ;;  %v262_v32 = vmul.f32 %v160_v55, %v160_v55 }
  0x61   : > { %v305_v17 = vadd.f32 %v304_v8, %v303_v11 }
  0x62   : > { %v210_v44 = vadd.f32 %v209_v34, %v208_v38  ;;  %v166_v34 = vld [vmem:[%s708_s30 + $0xf8] sm:$0xff]  ;;  %v263_v38 = vmul.f32 %v161_v61, %v161_v61  ;;  %v318_v42 = vsel %vm167_vm0, %v262_v32, 0.0 }
  0x63   : > { %v307_v22 = vadd.f32 %v306_v14, %v305_v17  ;;  %v229_v37 = vsel %vm167_vm0, %v166_v34, 0.0  ;;  %v268_v55 = vmul.f32 %v166_v34, %v166_v34 }
  0x64   : > { %v212_v50 = vadd.f32 %v211_v40, %v210_v44 }
  0x65   : > { %v309_v27 = vadd.f32 %v308_v20, %v307_v22  ;;  %v330_v61 = vsel %vm167_vm0, %v268_v55, 0.0 }
  0x66   : > { %v214_v56 = vadd.f32 %v213_v46, %v212_v50  ;;  %v320_v46 = vsel %vm167_vm0, %v263_v38, 0.0 }
  0x67   : > { %v311_v31 = vadd.f32 %v310_v24, %v309_v27 }
  0x68   : > { %v216_v62 = vadd.f32 %v215_v52, %v214_v56  ;;  %v267_v52 = vmul.f32 %v165_v25, %v165_v25  ;;  %v326_v56 = vsel %vm167_vm0, %v266_v48, 0.0 }
  0x69   : > { %v313_v36 = vadd.f32 %v312_v30, %v311_v31 }
  0x6a   : > { %v218_v4 = vadd.f32 %v217_v58, %v216_v62  ;;  %v328_v59 = vsel %vm167_vm0, %v267_v52, 0.0 }
  0x6b   : > { %v315_v40 = vadd.f32 %v314_v33, %v313_v36 }
  0x6c   : > { %v220_v10 = vadd.f32 %v219_v0, %v218_v4 }
  0x6d   : > { %v317_v44 = vadd.f32 %v316_v39, %v315_v40 }
  0x6e   : > { %v222_v16 = vadd.f32 %v221_v6, %v220_v10 }
  0x6f   : > { %v319_v47 = vadd.f32 %v318_v42, %v317_v44 }
  0x70   : > { %v224_v21 = vadd.f32 %v223_v12, %v222_v16 }
  0x71   : > { %v321_v51 = vadd.f32 %v320_v46, %v319_v47 }
  0x72   : > { %v226_v26 = vadd.f32 %v225_v18, %v224_v21 }
  0x73   : > { %v323_v54 = vadd.f32 %v322_v49, %v321_v51 }
  0x74   : > { %v228_v35 = vadd.f32 %v227_v28, %v226_v26 }
  0x75   : > { %v325_v58 = vadd.f32 %v324_v53, %v323_v54 }
  0x76   : > { %v230_v43 = vadd.f32 %v229_v37, %v228_v35 }
  0x77   : > { %v327_v60 = vadd.f32 %v326_v56, %v325_v58 }
  0x78   : > { %v231_v50 = vrot.slane %v230_v43, 4 }
  0x79   : > { %v329_v63 = vadd.f32 %v328_v59, %v327_v60 }
  0x7a   : > { %v232_v57 = vadd.f32 %v231_v50, %v230_v43 }
  0x7b   : > { %v331_v0 = vadd.f32 %v330_v61, %v329_v63 }
  0x7c   : > { %v233_v62 = vrot.slane %v232_v57, 2 }
  0x7d   : > { %v332_v2 = vrot.slane %v331_v0, 4 }
  0x7e   : > { %v234_v1 = vadd.f32 %v233_v62, %v232_v57 }
  0x7f   : > { %v333_v3 = vadd.f32 %v332_v2, %v331_v0 }
  0x80   : > { %v235_v4 = vrot.slane %v234_v1, 1 }
  0x81   : > { %v334_v5 = vrot.slane %v333_v3, 2 }
  0x82   : > { %v236_v7 = vadd.f32 %v235_v4, %v234_v1 }
  0x83   : > { %v335_v6 = vadd.f32 %v334_v5, %v333_v3 }
  0x85   : > { %v336_v8 = vrot.slane %v335_v6, 1 }
  0x87   : > { %v337_v9 = vadd.f32 %v336_v8, %v335_v6 }
  0x89   : > { %v339_v10 = vsel %vm338_vm1, %v236_v7, %v337_v9 }
  0x8a   : > { %341 = vst.msk [vmem:[%s134_s27] sm:$0x3] %vm340_vm2, %v339_v10 }
  0x8b   : > { %531 = shalt.err (!%p528_p2)
}
  0x8c   : > { %s532_s14 = scalar_lea.hbm %s815_s3, 32  ;;  %s536_s21 = scalar_lea.hbm %s860_s1, 64 }
  0x8d   : > { %p533_p4 = scmp.ne.s32.totalorder %s815_s3, %s532_s14  ;;  %p537_p9 = scmp.lt.u32.totalorder %s815_s3, %s860_s1 }
  0x8e   : > { %p538_p1 = scmp.lt.u32.totalorder %s536_s21, %s532_s14  ;;  %p540_p6 = scmp.lt.u32.totalorder %s532_s14, %s815_s3 }
  0x8f   : > { %p534_p5 = pnand %p533_p4, %p867_p11 }
  0x90   : > { %p539_p3 = por %p538_p1, %p537_p9 }
  0x91   : > { %p535_p7 = pneg %p534_p5 }
  0x92   : > { %p541_p12 = por %p540_p6, %p539_p3 }
  0x94   : > { %p542_p13 = pnand %p541_p12, %p535_p7 }
  0x96   : > { %545 = shalt.err (!%p542_p13)
}
  0x97   : > { %442 = dma.vmem_to_hbm [thread:$0]  (%p867_p11), %s817_s28, 32, %s815_s3, %s343_s4  }
  0x98 PF: > { %s368_s24 = sand.u32 1, %s572_s6   ;;  %p868_p8 = scmp.ne.s32.totalorder %s865_s19, 0 }
  0x99   : > { %p869_p10 = scmp.ge.s32.totalorder %s584_s9, 2  ;;  %s369_s26 = scalar_lea.sflag [#allocation4], %s368_s24 }
  0x9b   : > { %p449_p0 = pnand %p869_p10, %p868_p8 }
  0x9d   : > { %567 = dma.done.wait (!%p449_p0), %s369_s26, 32  }
  0x9e   : > { %569 = vsyncadd (!%p449_p0), %s369_s26, 4294967264  ;;  %p14_p2 = scmp.ge.s32.totalorder %s625_s12, 4   ;;  %s870_s6 = smov %s576_s7 }
  0x9f   : > { %s871_s7 = smov %s580_s8  ;;  %s872_s8 = smov %s637_s15 }
  0xa0   : > { %s873_s9 = smov %s625_s12  ;;  %16 = sbr.rel (!%p14_p2) target bundleno = 5 (0x5), region = 69 }
  0xa7   :  { %374 = vsyncpa [#allocation3], 1 }
  0xa8   :  { %376 = vsyncpa [#allocation3 + $0x1], 1 }
  0xa9   :  { %377 = vsyncpa [#allocation4], 1 }
  0xaa   :  { %379 = vsyncpa [#allocation4 + $0x1], 1 }

</bundles_post_ra>
